<compile_context>
chip_gen: v5e
topology: v5e:2x2
jax: 0.10.0
libtpu: 0.0.40
codegen_flags: <defaults>
</compile_context>

<pallas_src>
import jax
import jax.numpy as jnp
from jax.experimental import pallas as pl
from jax.experimental.pallas import tpu as pltpu

_LANE = 128
_SUBLANE = 8
_HEADROOM = 2 * 1024 * 1024  # compiler-internal scratch headroom in budgets


def _round_up(x, m):
    return ((x + m - 1) // m) * m


def _cdiv(a, b):
    return -(-a // b)


def _usable_vmem_bytes():
    """Generation-aware VMEM budget (~80% of per-core capacity)."""
    cap = 64 * 1024 * 1024  # conservative default = v7x per-TC VMEM
    try:
        cap = int(pltpu.get_tpu_info().vmem_capacity_bytes)
    except Exception:
        pass
    return int(0.8 * cap)


# --------------------------------------------------------------------------
# Kernels
# --------------------------------------------------------------------------
def _ffn_resident_kernel(x_ref, w1_ref, b1_ref, w2_ref, b2_ref, o_ref):
    """Fast path: all weights resident in VMEM, grid over batch tiles only."""
    h = jnp.dot(x_ref[...], w1_ref[...], preferred_element_type=jnp.float32)
    h = jnp.maximum(h + b1_ref[...], 0.0)
    if h.dtype != w2_ref.dtype:  # only cast for lower-precision weights
        h = h.astype(w2_ref.dtype)
    y = jnp.dot(h, w2_ref[...], preferred_element_type=jnp.float32)
    o_ref[...] = (y + b2_ref[...]).astype(o_ref.dtype)


def _ffn_hstream_kernel(x_ref, w1_ref, b1_ref, w2_ref, b2_ref, o_ref, acc_ref):
    """Grid = (batch_tiles, hidden_tiles); hidden is the reduction of matmul 2."""
    hk = pl.program_id(1)

    @pl.when(hk == 0)
    def _init():
        acc_ref[...] = jnp.zeros_like(acc_ref)

    h = jnp.dot(x_ref[...], w1_ref[...], preferred_element_type=jnp.float32)
    h = jnp.maximum(h + b1_ref[...], 0.0)
    if h.dtype != w2_ref.dtype:
        h = h.astype(w2_ref.dtype)
    acc_ref[...] += jnp.dot(h, w2_ref[...], preferred_element_type=jnp.float32)

    @pl.when(hk == pl.num_programs(1) - 1)
    def _finalize():
        o_ref[...] = (acc_ref[...] + b2_ref[...]).astype(o_ref.dtype)


def _ffn_histream_kernel(x_ref, w1_ref, b1_ref, w2_ref, b2_ref, o_ref,
                         h_acc_ref, acc_ref):
    """Grid = (batch_tiles, hidden_tiles, in_tiles); In is tiled too so the
    hidden tile can stay large for very wide inputs."""
    hk = pl.program_id(1)
    ik = pl.program_id(2)
    last_h = pl.num_programs(1) - 1
    last_i = pl.num_programs(2) - 1

    @pl.when(jnp.logical_and(hk == 0, ik == 0))
    def _init_acc():
        acc_ref[...] = jnp.zeros_like(acc_ref)

    @pl.when(ik == 0)
    def _init_h():
        h_acc_ref[...] = jnp.zeros_like(h_acc_ref)

    h_acc_ref[...] += jnp.dot(x_ref[...], w1_ref[...],
                              preferred_element_type=jnp.float32)

    @pl.when(ik == last_i)
    def _second_matmul():
        h = jnp.maximum(h_acc_ref[...] + b1_ref[...], 0.0)
        if h.dtype != w2_ref.dtype:
            h = h.astype(w2_ref.dtype)
        acc_ref[...] += jnp.dot(h, w2_ref[...],
                                preferred_element_type=jnp.float32)

    @pl.when(jnp.logical_and(hk == last_h, ik == last_i))
    def _finalize():
        o_ref[...] = (acc_ref[...] + b2_ref[...]).astype(o_ref.dtype)


# --------------------------------------------------------------------------
# Wrapper
# --------------------------------------------------------------------------
def feed_forward_network(x, w1, b1, w2, b2, *,
                         max_rows=512, max_hidden_tile=4096, max_in_tile=2048,
                         min_pallas_bytes=2 * 1024 * 1024):
    """y = relu(x @ w1 + b1) @ w2 + b2.

    x: [B, In]; w1: [In, H]; b1: [H] or [1, H]; w2: [H, Out]; b2: [Out] or [1, Out].
    """
    B, In = x.shape
    H, Out = w2.shape
    assert w1.shape == (In, H)
    b1 = b1.reshape(1, H)
    b2 = b2.reshape(1, Out)

    x_isz = jnp.dtype(x.dtype).itemsize
    w_isz = jnp.dtype(w1.dtype).itemsize

    in_p = _round_up(In, _LANE)
    h_p = _round_up(H, _LANE)
    out_p = _round_up(Out, _LANE)

    # ---- small-problem fallback: padding + grid overhead would dominate ----
    approx_bytes = (in_p * h_p + h_p * out_p) * w_isz + B * (in_p + out_p) * x_isz
    if min_pallas_bytes > 0 and (approx_bytes < min_pallas_bytes or B < 64):
        h = jnp.maximum(jnp.dot(x, w1) + b1, 0.0)
        return (jnp.dot(h, w2) + b2).astype(x.dtype)

    vmem_usable = _usable_vmem_bytes()
    max_h_r = _round_up(max_hidden_tile, _LANE)
    max_i_r = _round_up(max_in_tile, _LANE)

    def pad2(a, r, c):
        return jnp.pad(a, ((0, r - a.shape[0]), (0, c - a.shape[1])))

    # ---------------- resident fast path ----------------------------------
    # Weights DMA'd once (constant index_maps), no accumulator, 1-D grid.
    if h_p <= max_h_r and in_p <= max_i_r:
        nbt = _cdiv(B, max_rows)
        if B >= 2 * _SUBLANE:
            nbt = max(nbt, 2)           # >=2 "parallel" tiles -> both v7x TCs busy
        tm = _round_up(_cdiv(B, nbt), _SUBLANE)   # balanced batch tiles
        need = (2 * (in_p * h_p + h_p * out_p + h_p + out_p) * w_isz
                + 2 * tm * (in_p + out_p) * x_isz + _HEADROOM)
        if need <= vmem_usable:
            b_p = nbt * tm
            xp = pad2(x, b_p, in_p)
            w1p = pad2(w1, in_p, h_p)
            b1p = pad2(b1, 1, h_p)
            w2p = pad2(w2, h_p, out_p)
            b2p = pad2(b2, 1, out_p)

            flops = 2 * b_p * in_p * h_p + 2 * b_p * h_p * out_p
            bytes_accessed = ((xp.size + b_p * out_p) * x_isz
                              + (w1p.size + b1p.size + w2p.size + b2p.size) * w_isz)

            out = pl.pallas_call(
                _ffn_resident_kernel,
                out_shape=jax.ShapeDtypeStruct((b_p, out_p), x.dtype),
                grid_spec=pltpu.PrefetchScalarGridSpec(
                    num_scalar_prefetch=0,
                    grid=(nbt,),
                    in_specs=[
                        pl.BlockSpec((tm, in_p), lambda i: (i, 0)),     # x
                        pl.BlockSpec((in_p, h_p), lambda i: (0, 0)),    # w1 (resident)
                        pl.BlockSpec((1, h_p), lambda i: (0, 0)),       # b1 (resident)
                        pl.BlockSpec((h_p, out_p), lambda i: (0, 0)),   # w2 (resident)
                        pl.BlockSpec((1, out_p), lambda i: (0, 0)),     # b2 (resident)
                    ],
                    out_specs=pl.BlockSpec((tm, out_p), lambda i: (i, 0)),
                ),
                compiler_params=pltpu.CompilerParams(
                    dimension_semantics=("parallel",),
                    vmem_limit_bytes=vmem_usable,
                ),
                cost_estimate=pl.CostEstimate(flops=flops, transcendentals=0,
                                              bytes_accessed=bytes_accessed),
            )(xp, w1p, b1p, w2p, b2p)
            return out[:B, :Out]

    # ---------------- streaming path (hidden, optionally In, tiled) --------
    # In tiles (balanced) keep the hidden tile large even for wide inputs.
    n_it = _cdiv(in_p, max_i_r)
    ti = _round_up(_cdiv(in_p, n_it), _LANE)
    in_pad = n_it * ti

    # Batch tile: as large as allowed -- weight HBM re-streams scale with #tiles.
    nbt = _cdiv(B, max_rows)
    tm = _round_up(_cdiv(B, nbt), _SUBLANE)

    def stream_vmem(tm_, th_):
        return (2 * (ti * th_ + th_ * out_p + th_) * w_isz   # w1/w2/b1 slices (2 bufs)
                + 2 * out_p * w_isz                           # b2
                + 2 * tm_ * (ti + out_p) * x_isz              # x / out tiles (2 bufs)
                + tm_ * out_p * 4                             # f32 output accumulator
                + (tm_ * th_ * 4 if n_it > 1 else 0)          # f32 hidden accumulator
                + _HEADROOM)

    while True:
        th = min(h_p, max_h_r)
        while th > _LANE and stream_vmem(tm, th) > vmem_usable:
            th -= _LANE
        if stream_vmem(tm, th) <= vmem_usable or tm <= _SUBLANE:
            break
        tm = max(_SUBLANE, _round_up(tm // 2, _SUBLANE))

    # Re-balance hidden and batch tiles to minimize padding waste.
    n_ht = _cdiv(h_p, th)
    th = _round_up(_cdiv(h_p, n_ht), _LANE)
    h_pad = n_ht * th
    nbt = _cdiv(B, tm)
    tm = _round_up(_cdiv(B, nbt), _SUBLANE)
    b_p = nbt * tm

    xp = pad2(x, b_p, in_pad)
    w1p = pad2(w1, in_pad, h_pad)
    b1p = pad2(b1, 1, h_pad)
    w2p = pad2(w2, h_pad, out_p)
    b2p = pad2(b2, 1, out_p)

    flops = 2 * b_p * in_pad * h_pad + 2 * b_p * h_pad * out_p
    # Honest DMA estimate: weights re-streamed once per batch tile; x re-read
    # per hidden tile when In is also tiled.
    bytes_accessed = (
        xp.size * x_isz * (n_ht if n_it > 1 else 1)
        + (w1p.size + b1p.size + w2p.size) * w_isz * nbt
        + b2p.size * w_isz
        + b_p * out_p * x_isz)
    cost = pl.CostEstimate(flops=flops, transcendentals=0,
                           bytes_accessed=bytes_accessed)

    if n_it == 1:
        grid = (nbt, n_ht)
        in_specs = [
            pl.BlockSpec((tm, in_pad), lambda i, k: (i, 0)),   # x resident over k
            pl.BlockSpec((in_pad, th), lambda i, k: (0, k)),   # w1: stream hidden
            pl.BlockSpec((1, th), lambda i, k: (0, k)),        # b1: stream hidden
            pl.BlockSpec((th, out_p), lambda i, k: (k, 0)),    # w2: stream hidden
            pl.BlockSpec((1, out_p), lambda i, k: (0, 0)),     # b2: resident
        ]
        out_specs = pl.BlockSpec((tm, out_p), lambda i, k: (i, 0))
        scratch = [pltpu.VMEM((tm, out_p), jnp.float32)]
        kernel = _ffn_hstream_kernel
        sem = ("parallel", "arbitrary")
    else:
        grid = (nbt, n_ht, n_it)
        in_specs = [
            pl.BlockSpec((tm, ti), lambda i, k, j: (i, j)),       # x: stream In
            pl.BlockSpec((ti, th), lambda i, k, j: (j, k)),       # w1: stream In+hidden
            pl.BlockSpec((1, th), lambda i, k, j: (0, k)),        # b1: stream hidden
            pl.BlockSpec((th, out_p), lambda i, k, j: (k, 0)),    # w2: stream hidden
            pl.BlockSpec((1, out_p), lambda i, k, j: (0, 0)),     # b2: resident
        ]
        out_specs = pl.BlockSpec((tm, out_p), lambda i, k, j: (i, 0))
        scratch = [pltpu.VMEM((tm, th), jnp.float32),      # hidden (matmul-1) acc
                   pltpu.VMEM((tm, out_p), jnp.float32)]   # output (matmul-2) acc
        kernel = _ffn_histream_kernel
        sem = ("parallel", "arbitrary", "arbitrary")

    out = pl.pallas_call(
        kernel,
        out_shape=jax.ShapeDtypeStruct((b_p, out_p), x.dtype),
        grid_spec=pltpu.PrefetchScalarGridSpec(
            num_scalar_prefetch=0,
            grid=grid,
            in_specs=in_specs,
            out_specs=out_specs,
            scratch_shapes=scratch,
        ),
        compiler_params=pltpu.CompilerParams(
            dimension_semantics=sem,
            vmem_limit_bytes=vmem_usable,
        ),
        cost_estimate=cost,
    )(xp, w1p, b1p, w2p, b2p)

    return out[:B, :Out]


# --------------------------------------------------------------------------
# Helpers for the self-test
# --------------------------------------------------------------------------
def _ref_ffn(x, w1, b1, w2, b2):
    h = jnp.maximum(x @ w1 + b1.reshape(1, -1), 0.0)
    return h @ w2 + b2.reshape(1, -1)


def init_params(key, input_size, hidden_size, output_size):
    # Deterministic synthetic init (torch-Linear-style uniform bounds).
    k1, k2, k3, k4 = jax.random.split(key, 4)
    bound1 = 1.0 / jnp.sqrt(input_size)
    bound2 = 1.0 / jnp.sqrt(hidden_size)
    w1 = jax.random.uniform(k1, (input_size, hidden_size), jnp.float32, -bound1, bound1)
    b1 = jax.random.uniform(k2, (1, hidden_size), jnp.float32, -bound1, bound1)
    w2 = jax.random.uniform(k3, (hidden_size, output_size), jnp.float32, -bound2, bound2)
    b2 = jax.random.uniform(k4, (1, output_size), jnp.float32, -bound2, bound2)
    return w1, b1, w2, b2


if __name__ == "__main__":
    # TODO(synk): .fit() (Adam / CrossEntropyLoss training loop) and the
    # torch.load data pipeline are not part of the forward pass; not implemented.
    key = jax.random.PRNGKey(0)

    # 1) Tiny config matching the module ctor -> resident fast path (forced
    #    through Pallas so the kernel itself is exercised).
    B1, I1, H1, O1 = 8, 16, 32, 4
    kx, kp = jax.random.split(key)
    x1 = jax.random.normal(kx, (B1, I1), jnp.float32)
    p1 = init_params(kp, I1, H1, O1)
    y1 = jax.block_until_ready(feed_forward_network(x1, *p1, min_pallas_bytes=0))
    r1 = _ref_ffn(x1, *p1)
    assert y1.shape == (B1, O1)
    assert jnp.allclose(y1, r1, atol=1e-5, rtol=1e-5)

    # 1b) Same config through the default small-problem XLA fallback.
    y1b = jax.block_until_ready(feed_forward_network(x1, *p1))
    assert jnp.allclose(y1b, r1, atol=1e-5, rtol=1e-5)

    # 2) Hidden-streaming (2-D grid) path with an f32 accumulator.
    B2, I2, H2, O2 = 96, 256, 384, 8
    kx2, kp2 = jax.random.split(jax.random.PRNGKey(1))
    x2 = jax.random.normal(kx2, (B2, I2), jnp.float32)
    p2 = init_params(kp2, I2, H2, O2)
    y2 = jax.block_until_ready(
        feed_forward_network(x2, *p2, max_hidden_tile=128, min_pallas_bytes=0))
    r2 = _ref_ffn(x2, *p2)
    assert y2.shape == (B2, O2)
    assert jnp.allclose(y2, r2, atol=5e-4, rtol=5e-4)

    # 3) Hidden + In streaming (3-D grid) path with balanced batch tiles.
    B3, I3, H3, O3 = 384, 384, 640, 12
    kx3, kp3 = jax.random.split(jax.random.PRNGKey(2))
    x3 = jax.random.normal(kx3, (B3, I3), jnp.float32)
    p3 = init_params(kp3, I3, H3, O3)
    y3 = jax.block_until_ready(
        feed_forward_network(x3, *p3, max_rows=256, max_hidden_tile=128,
                             max_in_tile=128, min_pallas_bytes=0))
    r3 = _ref_ffn(x3, *p3)
    assert y3.shape == (B3, O3)
    assert jnp.allclose(y3, r3, atol=5e-4, rtol=5e-4)

    print("KERNEL_OK")
</pallas_src>

<mosaic_0001>
module attributes {stable_mosaic.version = 11 : i64} {
  func.func @_ffn_resident_kernel(%arg0: i32, %arg1: memref<8x128xf32, #tpu.memory_space<vmem>>, %arg2: memref<128x128xf32, #tpu.memory_space<vmem>>, %arg3: memref<1x128xf32, #tpu.memory_space<vmem>>, %arg4: memref<128x128xf32, #tpu.memory_space<vmem>>, %arg5: memref<1x128xf32, #tpu.memory_space<vmem>>, %arg6: memref<8x128xf32, #tpu.memory_space<vmem>>) attributes {dimension_semantics = [#tpu.dimension_semantics<parallel>], iteration_bounds = array<i64: 1>, scalar_prefetch = 0 : i64, scratch_operands = 0 : i64, tpu.core_type = #tpu.core_type<tc>, window_params = [{transform_indices = @transform_0, window_bounds = array<i64: 8, 128>}, {pipeline_mode = #tpu.pipeline_mode<synchronous>, transform_indices = @transform_1, window_bounds = array<i64: 128, 128>}, {pipeline_mode = #tpu.pipeline_mode<synchronous>, transform_indices = @transform_2, window_bounds = array<i64: 1, 128>}, {pipeline_mode = #tpu.pipeline_mode<synchronous>, transform_indices = @transform_3, window_bounds = array<i64: 128, 128>}, {pipeline_mode = #tpu.pipeline_mode<synchronous>, transform_indices = @transform_4, window_bounds = array<i64: 1, 128>}, {transform_indices = @transform_5, window_bounds = array<i64: 8, 128>}]} {
    %c0 = arith.constant 0 : index
    %c0_0 = arith.constant 0 : index
    %0 = vector.load %arg1[%c0, %c0_0] : memref<8x128xf32, #tpu.memory_space<vmem>>, vector<8x128xf32>
    %c0_1 = arith.constant 0 : index
    %c0_2 = arith.constant 0 : index
    %1 = vector.load %arg2[%c0_1, %c0_2] : memref<128x128xf32, #tpu.memory_space<vmem>>, vector<128x128xf32>
    %cst = arith.constant dense<0.000000e+00> : vector<8x128xf32>
    %2 = tpu.matmul %0, %1, %cst {dimension_numbers = #tpu.dot_dimension_numbers<[1], [0], [0], [1], [0, 0, 1, 1], [], []>} : vector<8x128xf32>, vector<128x128xf32>, vector<8x128xf32> -> vector<8x128xf32>
    %c0_3 = arith.constant 0 : index
    %c0_4 = arith.constant 0 : index
    %3 = vector.load %arg3[%c0_3, %c0_4] : memref<1x128xf32, #tpu.memory_space<vmem>>, vector<1x128xf32>
    %4 = vector.broadcast %3 : vector<1x128xf32> to vector<8x128xf32>
    %5 = arith.addf %2, %4 : vector<8x128xf32>
    %cst_5 = arith.constant 0.000000e+00 : f32
    %6 = vector.broadcast %cst_5 : f32 to vector<8x128xf32>
    %7 = arith.maximumf %5, %6 : vector<8x128xf32>
    %c0_6 = arith.constant 0 : index
    %c0_7 = arith.constant 0 : index
    %8 = vector.load %arg4[%c0_6, %c0_7] : memref<128x128xf32, #tpu.memory_space<vmem>>, vector<128x128xf32>
    %cst_8 = arith.constant dense<0.000000e+00> : vector<8x128xf32>
    %9 = tpu.matmul %7, %8, %cst_8 {dimension_numbers = #tpu.dot_dimension_numbers<[1], [0], [0], [1], [0, 0, 1, 1], [], []>} : vector<8x128xf32>, vector<128x128xf32>, vector<8x128xf32> -> vector<8x128xf32>
    %c0_9 = arith.constant 0 : index
    %c0_10 = arith.constant 0 : index
    %10 = vector.load %arg5[%c0_9, %c0_10] : memref<1x128xf32, #tpu.memory_space<vmem>>, vector<1x128xf32>
    %11 = vector.broadcast %10 : vector<1x128xf32> to vector<8x128xf32>
    %12 = arith.addf %9, %11 : vector<8x128xf32>
    %c0_11 = arith.constant 0 : index
    %c0_12 = arith.constant 0 : index
    %13 = vector.load %arg6[%c0_11, %c0_12] : memref<8x128xf32, #tpu.memory_space<vmem>>, vector<8x128xf32>
    tpu.vector_store %arg6[%c0_11, %c0_12], %12 {strides = array<i32>} : memref<8x128xf32, #tpu.memory_space<vmem>>, vector<8x128xf32>,
    return
  }
  func.func @transform_0(%arg0: i32) -> (i32, i32) {
    %c0_i32 = arith.constant 0 : i32
    %c0_i32_0 = arith.constant 0 : i32
    return %arg0, %c0_i32 : i32, i32
  }
  func.func @transform_1(%arg0: i32) -> (i32, i32) {
    %c0_i32 = arith.constant 0 : i32
    %c0_i32_0 = arith.constant 0 : i32
    %c0_i32_1 = arith.constant 0 : i32
    return %c0_i32, %c0_i32_0 : i32, i32
  }
  func.func @transform_2(%arg0: i32) -> (i32, i32) {
    %c0_i32 = arith.constant 0 : i32
    %c0_i32_0 = arith.constant 0 : i32
    %c0_i32_1 = arith.constant 0 : i32
    return %c0_i32, %c0_i32_0 : i32, i32
  }
  func.func @transform_3(%arg0: i32) -> (i32, i32) {
    %c0_i32 = arith.constant 0 : i32
    %c0_i32_0 = arith.constant 0 : i32
    %c0_i32_1 = arith.constant 0 : i32
    return %c0_i32, %c0_i32_0 : i32, i32
  }
  func.func @transform_4(%arg0: i32) -> (i32, i32) {
    %c0_i32 = arith.constant 0 : i32
    %c0_i32_0 = arith.constant 0 : i32
    %c0_i32_1 = arith.constant 0 : i32
    return %c0_i32, %c0_i32_0 : i32, i32
  }
  func.func @transform_5(%arg0: i32) -> (i32, i32) {
    %c0_i32 = arith.constant 0 : i32
    %c0_i32_0 = arith.constant 0 : i32
    return %arg0, %c0_i32 : i32, i32
  }
}

</mosaic_0001>

<bundles_post_ra>
// kernel: tpu_custom_call.1
= control target key start
LH: loop header
LB: loop body
LE: loop exit
PB: predicated region body
PF: predicated region fallthrough
CT: control target
= control target key end

     0   :  { %10 = vsyncpa [#allocation3], 0  ;;  %s331_s0 = inlined_call_operand.hbm [shape: f32[8,128], index: 0, kind: input, shape index: {}]   ;;  %s332_s1 = inlined_call_operand.hbm [shape: f32[128,128], index: 1, kind: input, shape index: {}]   ;;  %s333_s2 = inlined_call_operand.vmem [shape: f32[1,128], index: 2, kind: input, shape index: {}]   ;;  %s334_s3 = inlined_call_operand.hbm [shape: f32[128,128], index: 3, kind: input, shape index: {}]   ;;  %s335_s4 = inlined_call_operand.vmem [shape: f32[1,128], index: 4, kind: input, shape index: {}]   ;;  %s336_s5 = inlined_call_operand.hbm [shape: f32[8,128], index: 5, kind: output, shape index: {}]  }
   0x1   :  { %11 = vsyncpa [#allocation6], 0  ;;  %s28_s20 = sshll.u32 %s332_s1, 4  ;;  %s29_s20 = int_to_ptr.hbm [resolvable:$true] %s28_s20 }
   0x2   :  { %12 = vsyncpa [#allocation4], 0  ;;  %s277_s21 = smov [#allocation5]   ;;  %s18_s25 = sshll.u32 %s331_s0, 4  ;;  %s19_s25 = int_to_ptr.hbm [resolvable:$true] %s18_s25 }
   0x3   :  { %s30_s22 = sshll.u32 %s277_s21, 4  ;;  %s278_s26 = smov 128   ;;  %s31_s22 = int_to_ptr.vmem [resolvable:$true] %s30_s22 }
   0x4   :  { %s279_s27 = smov 8   ;;  %s280_s28 = smov [#allocation2]  }
   0x5   :  { %36 = dma.hbm_to_vmem [thread:$0]  %s29_s20, 2048, %s31_s22, [#allocation6], %s278_s26, %s278_s26, %s279_s27  }
   0x6   :  { %s20_s29 = sshll.u32 %s280_s28, 4  ;;  %s43_s7 = sshll.u32 %s334_s3, 4  ;;  %s21_s29 = int_to_ptr.vmem [resolvable:$true] %s20_s29  ;;  %s44_s7 = int_to_ptr.hbm [resolvable:$true] %s43_s7 }
   0x7   :  { %23 = dma.hbm_to_vmem [thread:$0]  %s19_s25, 128, %s21_s29, [#allocation3]  }
   0x8   :  { %s281_s1 = smov [#allocation7]  }
   0x9   :  { %s45_s8 = sshll.u32 %s281_s1, 4  ;;  %s46_s8 = int_to_ptr.vmem [resolvable:$true] %s45_s8 }
   0xa   :  { %51 = dma.hbm_to_vmem [thread:$0]  %s44_s7, 2048, %s46_s8, [#allocation6], %s278_s26, %s278_s26, %s279_s27  }
   0xb   :  { %271 = dma.done.wait [#allocation3], 128  }
   0xc   :  { %272 = vsyncadd [#allocation3], 4294967168 }
   0xd   :  { %273 = dma.done.wait [#allocation6], 4096  }
   0xe   :  { %274 = vsyncadd [#allocation6], 4294963200  ;;  %v82_v0 = vld [vmem:[#allocation5 + $0x78] sm:$0xff]  ;;  %v81_v1 = vld [vmem:[#allocation5 + $0x70] sm:$0xff]  ;;  %s282_s11 = smov [#allocation8]   ;;  %s156_s15 = sshll.u32 %s336_s5, 4  ;;  %s157_s15 = int_to_ptr.hbm [resolvable:$true] %s156_s15 }
   0xf   :  { %87 = vmatpush.msra.mxu0 %v82_v0  ;;  %v80_v2 = vld [vmem:[#allocation5 + $0x68] sm:$0xff]  ;;  %v79_v3 = vld [vmem:[#allocation5 + $0x60] sm:$0xff]  ;;  %v123_v4 = vld [vmem:[#allocation7 + $0x78] sm:$0xff]  ;;  %s154_s12 = sshll.u32 %s282_s11, 4  ;;  %s155_s12 = int_to_ptr.vmem [resolvable:$true] %s154_s12 }
  0x10   :  { %v78_v5 = vld [vmem:[#allocation5 + $0x58] sm:$0xff]  ;;  %128 = vmatpush.msra.mxu1 %v123_v4  ;;  %v122_v6 = vld [vmem:[#allocation7 + $0x70] sm:$0xff]  ;;  %v121_v7 = vld [vmem:[#allocation7 + $0x68] sm:$0xff] }
  0x11   :  { %88 = vmatpush.msra.mxu0 %v81_v1  ;;  %v77_v8 = vld [vmem:[#allocation5 + $0x50] sm:$0xff]  ;;  %v120_v9 = vld [vmem:[#allocation7 + $0x60] sm:$0xff]  ;;  %v76_v10 = vld [vmem:[#allocation5 + $0x48] sm:$0xff] }
  0x12   :  { %129 = vmatpush.msra.mxu1 %v122_v6  ;;  %v119_v11 = vld [vmem:[#allocation7 + $0x58] sm:$0xff]  ;;  %v75_v12 = vld [vmem:[#allocation5 + $0x40] sm:$0xff]  ;;  %v118_v13 = vld [vmem:[#allocation7 + $0x50] sm:$0xff] }
  0x13   :  { %89 = vmatpush.msra.mxu0 %v80_v2  ;;  %v74_v14 = vld [vmem:[#allocation5 + $0x38] sm:$0xff]  ;;  %v117_v15 = vld [vmem:[#allocation7 + $0x48] sm:$0xff]  ;;  %v73_v16 = vld [vmem:[#allocation5 + $0x30] sm:$0xff] }
  0x14   :  { %130 = vmatpush.msra.mxu1 %v121_v7  ;;  %v116_v17 = vld [vmem:[#allocation7 + $0x40] sm:$0xff]  ;;  %v72_v18 = vld [vmem:[#allocation5 + $0x28] sm:$0xff]  ;;  %v115_v19 = vld [vmem:[#allocation7 + $0x38] sm:$0xff] }
  0x15   :  { %90 = vmatpush.msra.mxu0 %v79_v3  ;;  %v71_v20 = vld [vmem:[#allocation5 + $0x20] sm:$0xff]  ;;  %v114_v21 = vld [vmem:[#allocation7 + $0x30] sm:$0xff]  ;;  %v70_v22 = vld [vmem:[#allocation5 + $0x18] sm:$0xff] }
  0x16   :  { %131 = vmatpush.msra.mxu1 %v120_v9  ;;  %v113_v23 = vld [vmem:[#allocation7 + $0x28] sm:$0xff]  ;;  %v69_v24 = vld [vmem:[#allocation5 + $0x10] sm:$0xff]  ;;  %v112_v25 = vld [vmem:[#allocation7 + $0x20] sm:$0xff] }
  0x17   :  { %91 = vmatpush.msra.mxu0 %v78_v5  ;;  %v68_v26 = vld [vmem:[#allocation5 + $0x8] sm:$0xff]  ;;  %v111_v27 = vld [vmem:[#allocation7 + $0x18] sm:$0xff]  ;;  %v67_v28 = vld [vmem:[#allocation5] sm:$0xff] }
  0x18   :  { %132 = vmatpush.msra.mxu1 %v119_v11  ;;  %v66_v29 = vld [vmem:[#allocation2] sm:$0xff]  ;;  %v110_v30 = vld [vmem:[#allocation7 + $0x10] sm:$0xff]  ;;  %v109_v31 = vld [vmem:[#allocation7 + $0x8] sm:$0xff] }
  0x19   :  { %92 = vmatpush.msra.mxu0 %v77_v8  ;;  %v108_v32 = vld [vmem:[#allocation7] sm:$0xff]  ;;  %v173_v33 = vld [vmem:[%s333_s2] ss:$0 sm:$0xff] }
  0x1a   :  { %133 = vmatpush.msra.mxu1 %v118_v13  ;;  %v174_v37 = vld [vmem:[%s335_s4] ss:$0 sm:$0xff] }
  0x1b   :  { %93 = vmatpush.msra.mxu0 %v76_v10 }
  0x1c   :  { %134 = vmatpush.msra.mxu1 %v117_v15 }
  0x1d   :  { %94 = vmatpush.msra.mxu0 %v75_v12 }
  0x1e   :  { %135 = vmatpush.msra.mxu1 %v116_v17 }
  0x1f   :  { %95 = vmatpush.msra.mxu0 %v74_v14 }
  0x20   :  { %136 = vmatpush.msra.mxu1 %v115_v19 }
  0x21   :  { %96 = vmatpush.msra.mxu0 %v73_v16 }
  0x22   :  { %137 = vmatpush.msra.mxu1 %v114_v21 }
  0x23   :  { %97 = vmatpush.msra.mxu0 %v72_v18 }
  0x24   :  { %138 = vmatpush.msra.mxu1 %v113_v23 }
  0x25   :  { %98 = vmatpush.msra.mxu0 %v71_v20 }
  0x26   :  { %139 = vmatpush.msra.mxu1 %v112_v25 }
  0x27   :  { %99 = vmatpush.msra.mxu0 %v70_v22 }
  0x28   :  { %140 = vmatpush.msra.mxu1 %v111_v27 }
  0x29   :  { %100 = vmatpush.msra.mxu0 %v69_v24 }
  0x2a   :  { %141 = vmatpush.msra.mxu1 %v110_v30 }
  0x2b   :  { %101 = vmatpush.msra.mxu0 %v68_v26 }
  0x2c   :  { %142 = vmatpush.msra.mxu1 %v109_v31 }
  0x2d   :  { %102 = vmatpush.msra.mxu0 %v67_v28 }
  0x2e   :  { %103 = vmatmul.f32.vlgmr.msra.gmra.mxu0 %v66_v29  ;;  %143 = vmatpush.msra.mxu1 %v108_v32 }
  0xab   :  { %v104_v34 = vpop.f32.mrf.mxu0 }
  0xac   :  { %v105_v35 = vadd.f32 %v173_v33, %v104_v34 }
  0xae   :  { %v107_v36 = vmax.f32 %v105_v35, 0.0 }
  0xb0   :  { %144 = vmatmul.f32.vlgmr.msra.gmra.mxu1 %v107_v36 }
 0x12d   :  { %v145_v38 = vpop.f32.mrf.mxu1 }
 0x12e   :  { %v146_v39 = vadd.f32 %v174_v37, %v145_v38 }
 0x130   :  { %148 = vst [vmem:[#allocation8] sm:$0xff] %v146_v39 }
 0x131   :  { %159 = dma.vmem_to_hbm [thread:$0]  %s155_s12, 128, %s157_s15, [#allocation4]  }
 0x132   :  { %275 = dma.done.wait [#allocation4], 128  }
 0x133   :  { %276 = vsyncadd [#allocation4], 4294967168 }
 0x134   :  { %164 = vsyncpa [#allocation3], 1 }
 0x135   :  { %165 = vsyncpa [#allocation6], 1 }
 0x136   :  { %166 = vsyncpa [#allocation4], 1 }

</bundles_post_ra>
